<compile_context>
chip_gen: v7x
topology: tpu7x:2x2x1
jax: 0.10.0
libtpu: 0.0.40
codegen_flags: <defaults>
</compile_context>

<pallas_src>
import functools

import jax
import jax.numpy as jnp
from jax import lax
from jax.experimental import pallas as pl
from jax.experimental.pallas import tpu as pltpu


def _round_up(x, m):
    return ((x + m - 1) // m) * m


def _cdiv(a, b):
    return (a + b - 1) // b


def _vmem_budgets():
    """(working-set budget, scoped vmem limit) in bytes, generation-aware."""
    try:
        cap = pltpu.get_tpu_info().vmem_capacity_bytes
    except Exception:
        cap = 64 * 1024 * 1024          # conservative fallback (v7x-sized)
    if cap >= 100 * 1024 * 1024:        # 128 MiB parts: v5e / v6e / v5p
        return 96 * 1024 * 1024, 110 * 1024 * 1024
    return 40 * 1024 * 1024, 48 * 1024 * 1024   # 64 MiB parts: v7x


def _vmem_bytes(block_b, d, k, in_itemsize):
    """Rough per-step VMEM working set (lane/sublane padding included)."""
    d_lane = _round_up(d, 128)
    k_lane = _round_up(k, 128)
    x_tile = 2 * block_b * d_lane * in_itemsize           # double-buffered x tile
    centers = 2 * _round_up(d, 8) * k_lane * in_itemsize  # resident (D, K) centers
    csq = 2 * 8 * k_lane * 4                               # resident (1, K) ||c||^2
    out_tile = 2 * block_b * k_lane * 4                    # double-buffered output tile
    interm = 4 * block_b * k_lane * 4                      # live f32 epilogue temps
    return x_tile + centers + csq + out_tile + interm


def _cluster_assignment_kernel(x_ref, ct_ref, csq_ref, out_ref, *, inv_alpha, power):
    # x_ref:   (TB, D)   batch tile of embeddings (f32 or bf16)
    # ct_ref:  (D, K)    cluster centers, pre-transposed (MXU-natural RHS)
    # csq_ref: (1, K)    precomputed ||c||^2, f32 (hoisted out of the grid loop)
    x = x_ref[...]

    # D-contraction on the MXU.
    xc = jnp.dot(x, ct_ref[...], preferred_element_type=jnp.float32)   # (TB, K) f32

    x_f32 = x.astype(jnp.float32)
    x_sq = jnp.sum(x_f32 * x_f32, axis=1, keepdims=True)               # (TB, 1)

    # Clamp: cancellation in ||x||^2 + ||c||^2 - 2<x,c> can go slightly negative,
    # and a fractional power of a negative base would NaN.
    norm_sq = jnp.maximum(x_sq + csq_ref[...] - 2.0 * xc, 0.0)         # (TB, K)

    t = 1.0 + norm_sq * inv_alpha
    if power == 1.0:            # alpha == 1: plain reciprocal, no pow at all.
        numerator = 1.0 / t
    elif power == 1.5:          # alpha == 2: reciprocal * rsqrt — no exp/log pair.
        numerator = (1.0 / t) * lax.rsqrt(t)
    elif power == 2.0:          # alpha == 3: squared reciprocal.
        r = 1.0 / t
        numerator = r * r
    else:                       # general alpha: one log + one exp on the EUP.
        numerator = jnp.exp(-power * jnp.log(t))

    # Normalize via a narrow (TB,1) reciprocal + broadcast multiply instead of a
    # full-tile divide (cuts divides from TB*K to TB).
    denom = jnp.sum(numerator, axis=1, keepdims=True)
    out_ref[...] = (numerator * (1.0 / denom)).astype(out_ref.dtype)


def cluster_assignment(inputs, cluster_centers, alpha, *, block_b=4096):
    """inputs: (B, D), cluster_centers: (K, D) -> (B, K) f32 soft assignments."""
    B, D = inputs.shape
    K, D2 = cluster_centers.shape
    assert D == D2, "embedding dims must match"

    # Keep bf16 end-to-end only if the caller already has bf16 (MXU-native but
    # reduced accuracy vs an f32 reference); otherwise compute in f32 like the module.
    if inputs.dtype == jnp.bfloat16 and cluster_centers.dtype == jnp.bfloat16:
        compute_dtype = jnp.bfloat16
    else:
        compute_dtype = jnp.float32
    itemsize = jnp.dtype(compute_dtype).itemsize
    row_align = 16 if compute_dtype == jnp.bfloat16 else 8

    x = inputs.astype(compute_dtype)
    # Pre-transposed centers: (D, K) avoids an in-kernel transpose every grid step.
    c_t = cluster_centers.astype(compute_dtype).T
    # Hoisted ||c||^2 precompute, shape (1, K), f32.
    c_f32 = cluster_centers.astype(jnp.float32)
    c_sq = jnp.sum(c_f32 * c_f32, axis=1)[None, :]

    # Pad the batch only up to sublane alignment (<= 15 rows); the trailing grid
    # block (if block_b does not divide B_pad) is clipped by Pallas — clipped rows
    # only affect their own (masked-out) output rows.
    B_pad = _round_up(B, row_align)
    if B_pad != B:
        x = jnp.pad(x, ((0, B_pad - B), (0, 0)))

    vmem_budget, vmem_limit = _vmem_budgets()
    block_b = max(row_align, _round_up(min(block_b, B_pad), row_align))
    while block_b > row_align and _vmem_bytes(block_b, D, K, itemsize) > vmem_budget:
        block_b = max(row_align, _round_up(block_b // 2, row_align))
    # Give the ("parallel",) grid axis at least 2 steps for large batches so it can
    # shard across multi-TensorCore parts (v7x); negligible cost on 1-TC chips.
    if B_pad >= 4 * row_align and _cdiv(B_pad, block_b) < 2:
        block_b = _round_up(_cdiv(B_pad, 2), row_align)

    grid = (_cdiv(B_pad, block_b),)

    kernel = functools.partial(
        _cluster_assignment_kernel,
        inv_alpha=1.0 / float(alpha),
        power=float(alpha + 1) / 2.0,
    )

    out = pl.pallas_call(
        kernel,
        out_shape=jax.ShapeDtypeStruct((B_pad, K), jnp.float32),
        grid_spec=pltpu.PrefetchScalarGridSpec(
            num_scalar_prefetch=0,
            grid=grid,
            in_specs=[
                # batch-tiled embeddings, full D per tile
                pl.BlockSpec((block_b, D), lambda i: (i, 0)),
                # centers + ||c||^2 fully resident each step (constant index map);
                # they are tiny relative to the x/out tiles so default buffering is fine.
                pl.BlockSpec((D, K), lambda i: (0, 0)),
                pl.BlockSpec((1, K), lambda i: (0, 0)),
            ],
            out_specs=pl.BlockSpec((block_b, K), lambda i: (i, 0)),
        ),
        compiler_params=pltpu.CompilerParams(
            dimension_semantics=("parallel",),
            vmem_limit_bytes=vmem_limit,
        ),
    )(x, c_t, c_sq)

    return out if B_pad == B else out[:B]


def xavier_uniform(key, shape, dtype=jnp.float32):
    # nn.init.xavier_uniform_ for a 2D (fan_out=K, fan_in=D) parameter.
    fan_out, fan_in = shape
    bound = (6.0 / (fan_in + fan_out)) ** 0.5
    return jax.random.uniform(key, shape, dtype=dtype, minval=-bound, maxval=bound)


def _ref_assign(x, centers, alpha):
    norm_sq = jnp.sum((x[:, None, :] - centers[None, :, :]) ** 2, axis=2)
    num = (1.0 / (1.0 + norm_sq / alpha)) ** (float(alpha + 1) / 2.0)
    return num / jnp.sum(num, axis=1, keepdims=True)


if __name__ == "__main__":
    # Small shapes consistent with the module's forward.
    B, D, K = 16, 32, 4
    alpha = 1.0

    key = jax.random.PRNGKey(0)
    k_x, k_c = jax.random.split(key)
    x = jax.random.normal(k_x, (B, D), dtype=jnp.float32)
    centers = xavier_uniform(k_c, (K, D))   # deterministic param init (no checkpoint)

    out = jax.block_until_ready(cluster_assignment(x, centers, alpha))
    ref = _ref_assign(x, centers, alpha)
    assert out.shape == (B, K)
    assert jnp.allclose(out, ref, atol=1e-5, rtol=1e-5)
    assert jnp.allclose(jnp.sum(out, axis=1), 1.0, atol=1e-5)

    # Non-divisible batch + alpha=2 (rsqrt epilogue path, small tail padding).
    B2 = 13
    x2 = jax.random.normal(jax.random.PRNGKey(1), (B2, D), dtype=jnp.float32)
    out2 = jax.block_until_ready(cluster_assignment(x2, centers, 2.0))
    assert out2.shape == (B2, K)
    assert jnp.allclose(out2, _ref_assign(x2, centers, 2.0), atol=1e-5, rtol=1e-5)

    # Multi-step grid + clipped trailing block + K not a multiple of 8.
    B3, K3 = 520, 10
    x3 = jax.random.normal(jax.random.PRNGKey(2), (B3, D), dtype=jnp.float32)
    c3 = xavier_uniform(jax.random.PRNGKey(3), (K3, D))
    out3 = jax.block_until_ready(cluster_assignment(x3, c3, 1.0))
    assert out3.shape == (B3, K3)
    assert jnp.allclose(out3, _ref_assign(x3, c3, 1.0), atol=1e-5, rtol=1e-5)

    print("KERNEL_OK")
</pallas_src>

<mosaic_0001>
module attributes {stable_mosaic.version = 11 : i64} {
  func.func @_cluster_assignment_kernel(%arg0: i32, %arg1: memref<16x32xf32, #tpu.memory_space<vmem>>, %arg2: memref<32x4xf32, #tpu.memory_space<vmem>>, %arg3: memref<1x4xf32, #tpu.memory_space<vmem>>, %arg4: memref<16x4xf32, #tpu.memory_space<vmem>>) attributes {dimension_semantics = [#tpu.dimension_semantics<parallel>], iteration_bounds = array<i64: 1>, scalar_prefetch = 0 : i64, scratch_operands = 0 : i64, tpu.core_type = #tpu.core_type<tc>, window_params = [{transform_indices = @transform_0, window_bounds = array<i64: 16, 32>}, {pipeline_mode = #tpu.pipeline_mode<synchronous>, transform_indices = @transform_1, window_bounds = array<i64: 32, 4>}, {pipeline_mode = #tpu.pipeline_mode<synchronous>, transform_indices = @transform_2, window_bounds = array<i64: 1, 4>}, {transform_indices = @transform_3, window_bounds = array<i64: 16, 4>}]} {
    %c0 = arith.constant 0 : index
    %c0_0 = arith.constant 0 : index
    %0 = vector.load %arg1[%c0, %c0_0] : memref<16x32xf32, #tpu.memory_space<vmem>>, vector<16x32xf32>
    %c0_1 = arith.constant 0 : index
    %c0_2 = arith.constant 0 : index
    %1 = vector.load %arg2[%c0_1, %c0_2] : memref<32x4xf32, #tpu.memory_space<vmem>>, vector<32x4xf32>
    %cst = arith.constant dense<0.000000e+00> : vector<16x4xf32>
    %2 = tpu.matmul %0, %1, %cst {dimension_numbers = #tpu.dot_dimension_numbers<[1], [0], [0], [1], [0, 0, 1, 1], [], []>} : vector<16x32xf32>, vector<32x4xf32>, vector<16x4xf32> -> vector<16x4xf32>
    %3 = arith.mulf %0, %0 : vector<16x32xf32>
    %cst_3 = arith.constant dense<0.000000e+00> : vector<16xf32>
    %4 = vector.multi_reduction <add>, %3, %cst_3 [1] : vector<16x32xf32> to vector<16xf32>
    %5 = vector.shape_cast %4 : vector<16xf32> to vector<16x1xf32>
    %c0_4 = arith.constant 0 : index
    %c0_5 = arith.constant 0 : index
    %6 = vector.load %arg3[%c0_4, %c0_5] : memref<1x4xf32, #tpu.memory_space<vmem>>, vector<1x4xf32>
    %7 = vector.broadcast %5 : vector<16x1xf32> to vector<16x4xf32>
    %8 = vector.broadcast %6 : vector<1x4xf32> to vector<16x4xf32>
    %9 = arith.addf %7, %8 : vector<16x4xf32>
    %cst_6 = arith.constant 2.000000e+00 : f32
    %10 = vector.broadcast %cst_6 : f32 to vector<16x4xf32>
    %11 = arith.mulf %10, %2 : vector<16x4xf32>
    %12 = arith.subf %9, %11 : vector<16x4xf32>
    %cst_7 = arith.constant 0.000000e+00 : f32
    %13 = vector.broadcast %cst_7 : f32 to vector<16x4xf32>
    %14 = arith.maximumf %12, %13 : vector<16x4xf32>
    %cst_8 = arith.constant 1.000000e+00 : f32
    %15 = vector.broadcast %cst_8 : f32 to vector<16x4xf32>
    %16 = arith.mulf %14, %15 : vector<16x4xf32>
    %cst_9 = arith.constant 1.000000e+00 : f32
    %17 = vector.broadcast %cst_9 : f32 to vector<16x4xf32>
    %18 = arith.addf %17, %16 : vector<16x4xf32>
    %cst_10 = arith.constant 1.000000e+00 : f32
    %19 = vector.broadcast %cst_10 : f32 to vector<16x4xf32>
    %20 = arith.divf %19, %18 : vector<16x4xf32>
    %cst_11 = arith.constant dense<0.000000e+00> : vector<16xf32>
    %21 = vector.multi_reduction <add>, %20, %cst_11 [1] : vector<16x4xf32> to vector<16xf32>
    %22 = vector.shape_cast %21 : vector<16xf32> to vector<16x1xf32>
    %cst_12 = arith.constant 1.000000e+00 : f32
    %23 = vector.broadcast %cst_12 : f32 to vector<16x1xf32>
    %24 = arith.divf %23, %22 : vector<16x1xf32>
    %25 = vector.broadcast %24 : vector<16x1xf32> to vector<16x4xf32>
    %26 = arith.mulf %20, %25 : vector<16x4xf32>
    %c0_13 = arith.constant 0 : index
    %c0_14 = arith.constant 0 : index
    %27 = vector.load %arg4[%c0_13, %c0_14] : memref<16x4xf32, #tpu.memory_space<vmem>>, vector<16x4xf32>
    tpu.vector_store %arg4[%c0_13, %c0_14], %26 {strides = array<i32>} : memref<16x4xf32, #tpu.memory_space<vmem>>, vector<16x4xf32>,
    return
  }
  func.func @transform_0(%arg0: i32) -> (i32, i32) {
    %c0_i32 = arith.constant 0 : i32
    %c0_i32_0 = arith.constant 0 : i32
    return %arg0, %c0_i32 : i32, i32
  }
  func.func @transform_1(%arg0: i32) -> (i32, i32) {
    %c0_i32 = arith.constant 0 : i32
    %c0_i32_0 = arith.constant 0 : i32
    %c0_i32_1 = arith.constant 0 : i32
    return %c0_i32, %c0_i32_0 : i32, i32
  }
  func.func @transform_2(%arg0: i32) -> (i32, i32) {
    %c0_i32 = arith.constant 0 : i32
    %c0_i32_0 = arith.constant 0 : i32
    %c0_i32_1 = arith.constant 0 : i32
    return %c0_i32, %c0_i32_0 : i32, i32
  }
  func.func @transform_3(%arg0: i32) -> (i32, i32) {
    %c0_i32 = arith.constant 0 : i32
    %c0_i32_0 = arith.constant 0 : i32
    return %arg0, %c0_i32 : i32, i32
  }
}

</mosaic_0001>

<bundles_post_ra>
// kernel: tpu_custom_call.1
= control target key start
LH: loop header
LB: loop body
LE: loop exit
PB: predicated region body
PF: predicated region fallthrough
CT: control target
= control target key end

     0   :  { %vm20_vm0 = vcmask 261120   ;;  %vm131_vm1 = vcmask 31744   ;;  %s241_s1 = inlined_call_operand.vmem [shape: f32[32,4], index: 1, kind: input, shape index: {}]   ;;  %s242_s0 = inlined_call_operand.vmem [shape: f32[16,32], index: 0, kind: input, shape index: {}]   ;;  %s243_s2 = inlined_call_operand.vmem [shape: f32[1,4], index: 2, kind: input, shape index: {}]   ;;  %s244_s3 = inlined_call_operand.vmem [shape: f32[16,4], index: 3, kind: output, shape index: {}]  }
   0x1   :  { %v16_v0 = vld [vmem:[%s241_s1] sm:$0xff]  ;;  %v17_v1 = vld [vmem:[%s241_s1 + $0x8] sm:$0xff]  ;;  %v18_v2 = vld [vmem:[%s241_s1 + $0x10] sm:$0xff] }
   0x2   :  { %v170_v3 = vpack.c.bf16 %v17_v1, %v16_v0  ;;  %v19_v4 = vld [vmem:[%s241_s1 + $0x18] sm:$0xff]  ;;  %v14_v5 = vld [vmem:[%s242_s0] sm:$0xff]  ;;  %v15_v6 = vld [vmem:[%s242_s0 + $0x8] sm:$0xff] }
   0x3   :  { %v174_v7 = vpack.c.bf16 %v19_v4, %v18_v2  ;;  %167 = vmatprep.mubr.msk.f32.mxu0 %vm20_vm0, %v14_v5  ;;  %v102_v8 = vmul.f32 %v14_v5, %v14_v5  ;;  %v103_v9 = vmul.f32 %v15_v6, %v15_v6  ;;  %v152_v13 = vld [vmem:[%s243_s2] ss:$0 sm:$0xff] }
   0x4   :  { %171 = vmatprep.subr.bf16.mxu0 %v170_v3 }
   0x5   :  { %173 = vmatpush3.bf16.msra.mxu0 %v170_v3  ;;  %v104_v10 = vsel %vm20_vm0, %v102_v8, 0.0  ;;  %v107_v11 = vsel %vm20_vm0, %v103_v9, 0.0 }
   0x6   :  { %175 = vmatprep.subr.bf16.mxu0 %v174_v7  ;;  %105 = vadd.xlane.f32.xlu0 %v104_v10 }
   0x9   :  { %177 = vmatpush3.bf16.msra.mxu0 %v174_v7 }
   0xa   :  { %108 = vadd.xlane.f32.xlu0 %v107_v11 }
   0xc   :  { %168 = vmatmul.mubr.msk.f32.vlgmr.msra.gmra.mrb[0].mxu0 %vm20_vm0, %v15_v6 }
  0x93   :  { %v106_v12 = vpop.xlane.xlu0 %105 }
  0x94   :  { %v117_v16 = vadd.f32 %v152_v13, %v106_v12 }
  0x97   :  { %v109_v14 = vpop.xlane.xlu0 %108 }
  0x98   :  { %v118_v15 = vadd.f32 %v152_v13, %v109_v14 }
  0xdf   :  { %v169_v17 = vpop.f32.mrb[0].mxu0 }
  0xe0   :  { %v120_v18 = vmul.f32 2.0, %v169_v17  ;;  %v93_v19 = vpop.f32.mrb[1].mxu0 }
  0xe1   :  { %v119_v20 = vmul.f32 2.0, %v93_v19 }
  0xe2   :  { %v122_v21 = vsub.f32 %v118_v15, %v120_v18 }
  0xe3   :  { %v121_v22 = vsub.f32 %v117_v16, %v119_v20 }
  0xe4   :  { %v124_v23 = vmax.f32 %v122_v21, 0.0 }
  0xe5   :  { %v123_v24 = vmax.f32 %v121_v22, 0.0 }
  0xe6   :  { %v126_v25 = vadd.f32 1.0, %v124_v23 }
  0xe7   :  { %v125_v26 = vadd.f32 1.0, %v123_v24 }
  0xe9   :  { %178 = vrcp.f32 %v125_v26 }
  0xea   :  { %180 = vrcp.f32 %v126_v25 }
  0xf3   :  { %v179_v27 = vpop.eup %178 }
  0xf4   :  { %v132_v28 = vsel %vm131_vm1, %v179_v27, 0.0  ;;  %v181_v29 = vpop.eup %180 }
  0xf5   :  { %133 = vadd.xlane.f32.xlu1 %v132_v28  ;;  %v135_v30 = vsel %vm131_vm1, %v181_v29, 0.0 }
  0xf9   :  { %136 = vadd.xlane.f32.xlu1 %v135_v30 }
 0x182   :  { %v134_v31 = vpop.xlane.xlu1 %133 }
 0x183   :  { %182 = vrcp.f32 %v134_v31 }
 0x186   :  { %v137_v32 = vpop.xlane.xlu1 %136 }
 0x187   :  { %184 = vrcp.f32 %v137_v32 }
 0x18d   :  { %v183_v33 = vpop.eup %182 }
 0x18e   :  { %v142_v34 = vmul.f32 %v183_v33, %v179_v27 }
 0x190   :  { %144 = vst.msk [vmem:[%s244_s3] sm:$0xff] %vm131_vm1, %v142_v34 }
 0x191   :  { %v185_v35 = vpop.eup %184 }
 0x192   :  { %v143_v36 = vmul.f32 %v185_v35, %v181_v29 }
 0x194   :  { %145 = vst.msk [vmem:[%s244_s3 + $0x8] sm:$0xff] %vm131_vm1, %v143_v36 }

</bundles_post_ra>
